<compile_context>
chip_gen: v7x
topology: tpu7x:2x2x1
jax: 0.10.0
libtpu: 0.0.40
codegen_flags: <defaults>
</compile_context>

<pallas_src>
import functools
import math

import jax
import jax.numpy as jnp
import numpy as np
from jax.experimental import pallas as pl
from jax.experimental.pallas import tpu as pltpu


# ----------------------------------------------------------------------------
# Pallas kernel: one grid step processes a tile of TN rows and runs the whole
# forward pass (fused fc1+role-encoder, fused GRU cell, hypernet Q head).
# ----------------------------------------------------------------------------
def llm_agent_kernel(role_ref, x_ref, h_ref, w_ref, out_ref, *, H, R, A, offs):
    f32 = jnp.float32
    RN = role_ref.shape[-1]
    E = x_ref.shape[-1]
    AR = A * R
    ENC_W = AR + H
    o_we, o_be, o_wg, o_bg, o_hw, o_s, o_hb, o_db = offs

    # --- fused fc1 + role encoder (role-encoder weight pre-tiled over actions)
    rolein = jnp.concatenate([role_ref[...], x_ref[...]], axis=-1)      # (TN, RN+E)
    w_enc = w_ref[o_we:o_we + RN + E, 0:ENC_W]
    b_enc = w_ref[o_be:o_be + 1, 0:ENC_W]
    enc = jnp.dot(rolein, w_enc, preferred_element_type=f32) + b_enc
    enc = jnp.maximum(enc, 0.0)                                         # one relu for both
    emb_t = enc[:, 0:AR]            # (TN, A*R): emb[n, r] broadcast over actions j
    x = enc[:, AR:AR + H]           # (TN, H):   relu(fc1(inputs)), vreg-aligned slice
    emb = emb_t[:, 0:R]             # (TN, R)

    # --- GRU cell: one fused (2H, 4H) matmul -> [r_pre | z_pre | nx | nh] ----
    h = h_ref[...]
    xh = jnp.concatenate([x, h], axis=-1)                               # (TN, 2H)
    w_gru = w_ref[o_wg:o_wg + 2 * H, 0:4 * H]
    b_gru = w_ref[o_bg:o_bg + 1, 0:4 * H]
    g = jnp.dot(xh, w_gru, preferred_element_type=f32) + b_gru          # (TN, 4H)
    r = jax.nn.sigmoid(g[:, 0:H])
    z = jax.nn.sigmoid(g[:, H:2 * H])
    n = jnp.tanh(g[:, 2 * H:3 * H] + r * g[:, 3 * H:4 * H])
    hh = (1.0 - z) * n + z * h

    # --- hypernetwork Q head (fully MXU) --------------------------------------
    #   q[n,j] = sum_{r,k} emb[n,r] hh[n,k] Wdw[k*A+j, r]
    #          + sum_k hh[n,k] bdw[k*A+j] + (emb @ Wdb^T + bdb)[n,j]
    w_hyper = w_ref[o_hw:o_hw + H, 0:AR]                                # (H, A*R)
    s_mat = w_ref[o_s:o_s + AR, 0:A]                                    # (A*R, A) segment-sum
    w_hb = w_ref[o_hb:o_hb + H + R, 0:A]                                # (H+R, A) fused biases
    b_db = w_ref[o_db:o_db + 1, 0:A]                                    # (1, A)
    gq = jnp.dot(hh, w_hyper, preferred_element_type=f32)               # (TN, A*R)
    q = jnp.dot(emb_t * gq, s_mat, preferred_element_type=f32)          # (TN, A)
    q = q + jnp.dot(jnp.concatenate([hh, emb], axis=-1), w_hb,
                    preferred_element_type=f32) + b_db

    # --- packed output: write only the [hh | q] lanes (rest left untouched) --
    out_ref[:, 0:H + A] = jnp.concatenate([hh, q], axis=-1)


# ----------------------------------------------------------------------------
# Wrapper: tile selection, padding, weight re-layout + slab packing (plain JAX)
# ----------------------------------------------------------------------------
def _round_up(x, m):
    return ((x + m - 1) // m) * m


def _choose_row_tile(n):
    n8 = _round_up(max(n, 1), 8)
    tn = min(2048, n8)
    if tn == n8:
        # Fits one grid step.  Split in two only when each half gets >=128 rows:
        # negligible overhead on single-TC v5e/v6e, feeds both v7x TensorCores.
        if n8 >= 256:
            tn = _round_up(n8 // 2, 8)
        return tn
    # Multi-step: keep an even step count so v7x's two cores get balanced halves.
    steps = -(-n8 // tn)
    if steps % 2:
        steps += 1
        tn = _round_up(-(-n8 // steps), 8)
    return tn


def llm_agent_forward(params, inputs, hidden_state, role_one_hot, args):
    b, a, e = inputs.shape
    H = args.rnn_hidden_dim
    R = args.role_embedding_dim
    A = args.n_actions
    RN = args.role_num
    AR = A * R
    N = b * a
    f32 = jnp.float32

    x2d = inputs.reshape(N, e).astype(f32)
    h2d = hidden_state.reshape(N, H).astype(f32)
    role2d = role_one_hot.reshape(N, RN).astype(f32)

    TN = _choose_row_tile(N)
    N_pad = _round_up(N, TN)
    if N_pad != N:
        pad = ((0, N_pad - N), (0, 0))
        x2d = jnp.pad(x2d, pad)
        h2d = jnp.pad(h2d, pad)
        role2d = jnp.pad(role2d, pad)

    # --- weight re-layout (pure parameter plumbing, done once in JAX) -------
    # Fused encoder: [role | obs] @ W_enc, columns = [emb tiled over actions | fc1]
    wre_t = params["re_w"].T.astype(f32)                     # (RN, R)
    wre_tiled = jnp.tile(wre_t, (1, A))                      # (RN, A*R)
    bre_tiled = jnp.tile(params["re_b"].astype(f32), (A,))   # (A*R,)
    w1t = params["fc1_w"].T.astype(f32)                      # (e, H)
    w_enc = jnp.zeros((RN + e, AR + H), f32)
    w_enc = w_enc.at[:RN, :AR].set(wre_tiled)
    w_enc = w_enc.at[RN:, AR:].set(w1t)
    b_enc = jnp.concatenate([bre_tiled, params["fc1_b"].astype(f32)])[None, :]

    # Fused GRU gate weight: [x|h] @ W_gru -> [r_pre | z_pre | nx | nh]
    w_ih = params["gru_w_ih"].astype(f32)
    w_hh = params["gru_w_hh"].astype(f32)
    b_ih = params["gru_b_ih"].astype(f32)
    b_hh = params["gru_b_hh"].astype(f32)
    zhh = jnp.zeros((H, H), f32)
    w_gru = jnp.concatenate([
        jnp.concatenate([w_ih[0:H].T, w_ih[H:2 * H].T, w_ih[2 * H:].T, zhh], axis=1),
        jnp.concatenate([w_hh[0:H].T, w_hh[H:2 * H].T, zhh, w_hh[2 * H:].T], axis=1),
    ], axis=0)                                               # (2H, 4H)
    b_gru = jnp.concatenate([b_ih[0:H] + b_hh[0:H], b_ih[H:2 * H] + b_hh[H:2 * H],
                             b_ih[2 * H:], b_hh[2 * H:]])[None, :]   # (1, 4H)

    # Hypernet head: Wg[k, j*R + r] = dw_w[k*A + j, r]; S = segment-sum over r.
    w_hyper = params["dw_w"].reshape(H, AR).astype(f32)      # (H, A*R)
    smat = jnp.repeat(jnp.eye(A, dtype=f32), R, axis=0)      # (A*R, A)
    w_hb = jnp.concatenate([params["dw_b"].reshape(H, A).astype(f32),
                            params["db_w"].T.astype(f32)], axis=0)     # (H+R, A)
    bdb = params["db_b"][None, :].astype(f32)                # (1, A)

    # --- pack all weights/biases into a single lane-padded slab (one DMA) ---
    WW = max(AR + H, 4 * H)
    sections = [w_enc, b_enc, w_gru, b_gru, w_hyper, smat, w_hb, bdb]
    offs, padded, row = [], [], 0
    for arr in sections:
        offs.append(row)
        arr = jnp.pad(arr, ((0, (-arr.shape[0]) % 8), (0, WW - arr.shape[1])))
        padded.append(arr)
        row += arr.shape[0]
    slab = jnp.concatenate(padded, axis=0)                   # (rows, WW)

    OUT = _round_up(H + A, 128)                              # lane-dense packed output width

    kernel = functools.partial(llm_agent_kernel, H=H, R=R, A=A, offs=tuple(offs))

    flops_per_row = 2 * (
        (RN + e) * (AR + H)        # fused encoder
        + (2 * H) * (4 * H)        # fused GRU gates
        + H * AR + AR * A          # hypernet bilinear
        + (H + R) * A              # fused hypernet biases
    )
    cost = pl.CostEstimate(
        flops=int(N_pad * flops_per_row),
        transcendentals=int(N_pad * 3 * H),
        bytes_accessed=int(4 * (N_pad * (e + H + RN + OUT) + slab.size)),
    )

    packed = pl.pallas_call(
        kernel,
        grid=(N_pad // TN,),
        in_specs=[
            pl.BlockSpec((TN, RN), lambda i: (i, 0)),
            pl.BlockSpec((TN, e), lambda i: (i, 0)),
            pl.BlockSpec((TN, H), lambda i: (i, 0)),
            pl.BlockSpec(slab.shape, lambda i: (0, 0)),      # whole weight slab, fetched once
        ],
        out_specs=pl.BlockSpec((TN, OUT), lambda i: (i, 0)),
        out_shape=jax.ShapeDtypeStruct((N_pad, OUT), f32),
        compiler_params=pltpu.CompilerParams(dimension_semantics=("parallel",)),
        cost_estimate=cost,
    )(role2d, x2d, h2d, slab)

    hh = packed[:N, 0:H].reshape(b, a, H)
    q = packed[:N, H:H + A].reshape(b, a, A)
    return q, hh


# ----------------------------------------------------------------------------
# Deterministic parameter init (PyTorch nn.Linear / GRUCell default scheme)
# ----------------------------------------------------------------------------
def init_params(key, input_shape, args):
    H = args.rnn_hidden_dim
    R = args.role_embedding_dim
    A = args.n_actions
    RN = args.role_num

    keys = jax.random.split(key, 10)

    def linear(k, fan_in, fan_out):
        k1, k2 = jax.random.split(k)
        bound = 1.0 / math.sqrt(fan_in)
        w = jax.random.uniform(k1, (fan_out, fan_in), jnp.float32, -bound, bound)
        bb = jax.random.uniform(k2, (fan_out,), jnp.float32, -bound, bound)
        return w, bb

    fc1_w, fc1_b = linear(keys[0], input_shape, H)
    bound = 1.0 / math.sqrt(H)
    gru_w_ih = jax.random.uniform(keys[1], (3 * H, H), jnp.float32, -bound, bound)
    gru_w_hh = jax.random.uniform(keys[2], (3 * H, H), jnp.float32, -bound, bound)
    gru_b_ih = jax.random.uniform(keys[3], (3 * H,), jnp.float32, -bound, bound)
    gru_b_hh = jax.random.uniform(keys[4], (3 * H,), jnp.float32, -bound, bound)
    re_w, re_b = linear(keys[5], RN, R)
    dw_w, dw_b = linear(keys[6], R, H * A)
    db_w, db_b = linear(keys[7], R, A)

    return dict(
        fc1_w=fc1_w, fc1_b=fc1_b,
        gru_w_ih=gru_w_ih, gru_w_hh=gru_w_hh,
        gru_b_ih=gru_b_ih, gru_b_hh=gru_b_hh,
        re_w=re_w, re_b=re_b,
        dw_w=dw_w, dw_b=dw_b,
        db_w=db_w, db_b=db_b,
    )


# ----------------------------------------------------------------------------
# Pure-JAX reference (direct port of the PyTorch forward) for verification.
# ----------------------------------------------------------------------------
def reference_forward(params, inputs, hidden_state, role_one_hot, args):
    b, a, e = inputs.shape
    H = args.rnn_hidden_dim
    x = inputs.reshape(-1, e)
    role = role_one_hot.reshape(-1, args.role_num)
    h = hidden_state.reshape(-1, H)

    x = jax.nn.relu(x @ params["fc1_w"].T + params["fc1_b"])
    gi = x @ params["gru_w_ih"].T + params["gru_b_ih"]
    gh = h @ params["gru_w_hh"].T + params["gru_b_hh"]
    r = jax.nn.sigmoid(gi[:, :H] + gh[:, :H])
    z = jax.nn.sigmoid(gi[:, H:2 * H] + gh[:, H:2 * H])
    n = jnp.tanh(gi[:, 2 * H:] + r * gh[:, 2 * H:])
    hh = (1.0 - z) * n + z * h

    emb = jax.nn.relu(role @ params["re_w"].T + params["re_b"])
    w = emb @ params["dw_w"].T + params["dw_b"]        # (N, H*A)
    bdec = emb @ params["db_w"].T + params["db_b"]     # (N, A)
    A = args.n_actions
    q = jnp.einsum("nh,nha->na", hh, w.reshape(-1, H, A)) + bdec
    return q.reshape(b, a, A), hh.reshape(b, a, H)


def _run_and_check(params, args, key, b, a, e):
    kx, kh, kr = jax.random.split(key, 3)
    inputs = jax.random.normal(kx, (b, a, e), jnp.float32)
    hidden_state = jax.random.normal(kh, (b, a, args.rnn_hidden_dim), jnp.float32)
    role_idx = jax.random.randint(kr, (b, a), 0, args.role_num)
    role_one_hot = jax.nn.one_hot(role_idx, args.role_num, dtype=jnp.float32)

    q, hh = llm_agent_forward(params, inputs, hidden_state, role_one_hot, args)
    jax.block_until_ready((q, hh))

    q_ref, hh_ref = reference_forward(params, inputs, hidden_state, role_one_hot, args)
    np.testing.assert_allclose(np.asarray(q), np.asarray(q_ref), rtol=1e-4, atol=1e-4)
    np.testing.assert_allclose(np.asarray(hh), np.asarray(hh_ref), rtol=1e-4, atol=1e-4)


if __name__ == "__main__":
    class Args:
        pass

    args = Args()
    args.rnn_hidden_dim = 32
    args.role_num = 8
    args.role_embedding_dim = 16
    args.n_actions = 8
    args.use_layer_norm = False
    args.use_orthogonal = False

    e = 16
    key = jax.random.PRNGKey(0)
    kp, k1, k2 = jax.random.split(key, 3)
    params = init_params(kp, e, args)

    # small shape (single-tile path)
    _run_and_check(params, args, k1, b=2, a=4, e=e)
    # larger shape (multi-row + row-padding path)
    _run_and_check(params, args, k2, b=33, a=5, e=e)

    print("KERNEL_OK")
</pallas_src>

<mosaic_0001>
module attributes {stable_mosaic.version = 11 : i64} {
  func.func @llm_agent_kernel(%arg0: i32, %arg1: memref<8x8xf32, #tpu.memory_space<vmem>>, %arg2: memref<8x16xf32, #tpu.memory_space<vmem>>, %arg3: memref<8x32xf32, #tpu.memory_space<vmem>>, %arg4: memref<320x160xf32, #tpu.memory_space<vmem>>, %arg5: memref<8x128xf32, #tpu.memory_space<vmem>>) attributes {dimension_semantics = [#tpu.dimension_semantics<parallel>], iteration_bounds = array<i64: 1>, scalar_prefetch = 0 : i64, scratch_operands = 0 : i64, tpu.core_type = #tpu.core_type<tc>, window_params = [{transform_indices = @transform_0, window_bounds = array<i64: 8, 8>}, {transform_indices = @transform_1, window_bounds = array<i64: 8, 16>}, {transform_indices = @transform_2, window_bounds = array<i64: 8, 32>}, {pipeline_mode = #tpu.pipeline_mode<synchronous>, transform_indices = @transform_3, window_bounds = array<i64: 320, 160>}, {transform_indices = @transform_4, window_bounds = array<i64: 8, 128>}]} {
    %c0 = arith.constant 0 : index
    %c0_0 = arith.constant 0 : index
    %0 = vector.load %arg1[%c0, %c0_0] : memref<8x8xf32, #tpu.memory_space<vmem>>, vector<8x8xf32>
    %c0_1 = arith.constant 0 : index
    %c0_2 = arith.constant 0 : index
    %1 = vector.load %arg2[%c0_1, %c0_2] : memref<8x16xf32, #tpu.memory_space<vmem>>, vector<8x16xf32>
    %2 = tpu.concatenate %0, %1 in 1 : vector<8x8xf32>, vector<8x16xf32> -> vector<8x24xf32>
    %c0_3 = arith.constant 0 : index
    %c0_4 = arith.constant 0 : index
    %3 = vector.load %arg4[%c0_3, %c0_4] : memref<320x160xf32, #tpu.memory_space<vmem>>, vector<24x160xf32>
    %c24 = arith.constant 24 : index
    %c0_5 = arith.constant 0 : index
    %4 = vector.load %arg4[%c24, %c0_5] : memref<320x160xf32, #tpu.memory_space<vmem>>, vector<1x160xf32>
    %cst = arith.constant dense<0.000000e+00> : vector<8x160xf32>
    %5 = tpu.matmul %2, %3, %cst {dimension_numbers = #tpu.dot_dimension_numbers<[1], [0], [0], [1], [0, 0, 1, 1], [], []>} : vector<8x24xf32>, vector<24x160xf32>, vector<8x160xf32> -> vector<8x160xf32>
    %6 = vector.broadcast %4 : vector<1x160xf32> to vector<8x160xf32>
    %7 = arith.addf %5, %6 : vector<8x160xf32>
    %cst_6 = arith.constant 0.000000e+00 : f32
    %8 = vector.broadcast %cst_6 : f32 to vector<8x160xf32>
    %9 = arith.maximumf %7, %8 : vector<8x160xf32>
    %10 = vector.extract_strided_slice %9 {offsets = [0, 0], sizes = [8, 128], strides = [1, 1]} : vector<8x160xf32> to vector<8x128xf32>
    %11 = vector.extract_strided_slice %9 {offsets = [0, 128], sizes = [8, 32], strides = [1, 1]} : vector<8x160xf32> to vector<8x32xf32>
    %12 = vector.extract_strided_slice %10 {offsets = [0, 0], sizes = [8, 16], strides = [1, 1]} : vector<8x128xf32> to vector<8x16xf32>
    %c0_7 = arith.constant 0 : index
    %c0_8 = arith.constant 0 : index
    %13 = vector.load %arg3[%c0_7, %c0_8] : memref<8x32xf32, #tpu.memory_space<vmem>>, vector<8x32xf32>
    %14 = tpu.concatenate %11, %13 in 1 : vector<8x32xf32>, vector<8x32xf32> -> vector<8x64xf32>
    %c32 = arith.constant 32 : index
    %c0_9 = arith.constant 0 : index
    %15 = vector.load %arg4[%c32, %c0_9] : memref<320x160xf32, #tpu.memory_space<vmem>>, vector<64x128xf32>
    %c96 = arith.constant 96 : index
    %c0_10 = arith.constant 0 : index
    %16 = vector.load %arg4[%c96, %c0_10] : memref<320x160xf32, #tpu.memory_space<vmem>>, vector<1x128xf32>
    %cst_11 = arith.constant dense<0.000000e+00> : vector<8x128xf32>
    %17 = tpu.matmul %14, %15, %cst_11 {dimension_numbers = #tpu.dot_dimension_numbers<[1], [0], [0], [1], [0, 0, 1, 1], [], []>} : vector<8x64xf32>, vector<64x128xf32>, vector<8x128xf32> -> vector<8x128xf32>
    %18 = vector.broadcast %16 : vector<1x128xf32> to vector<8x128xf32>
    %19 = arith.addf %17, %18 : vector<8x128xf32>
    %20 = vector.extract_strided_slice %19 {offsets = [0, 0], sizes = [8, 32], strides = [1, 1]} : vector<8x128xf32> to vector<8x32xf32>
    %21 = arith.negf %20 : vector<8x32xf32>
    %22 = math.exp %21 : vector<8x32xf32>
    %cst_12 = arith.constant 1.000000e+00 : f32
    %23 = vector.broadcast %cst_12 : f32 to vector<8x32xf32>
    %24 = arith.addf %23, %22 : vector<8x32xf32>
    %25 = arith.divf %23, %24 : vector<8x32xf32>
    %26 = vector.extract_strided_slice %19 {offsets = [0, 32], sizes = [8, 32], strides = [1, 1]} : vector<8x128xf32> to vector<8x32xf32>
    %27 = arith.negf %26 : vector<8x32xf32>
    %28 = math.exp %27 : vector<8x32xf32>
    %cst_13 = arith.constant 1.000000e+00 : f32
    %29 = vector.broadcast %cst_13 : f32 to vector<8x32xf32>
    %30 = arith.addf %29, %28 : vector<8x32xf32>
    %31 = arith.divf %29, %30 : vector<8x32xf32>
    %32 = vector.extract_strided_slice %19 {offsets = [0, 64], sizes = [8, 32], strides = [1, 1]} : vector<8x128xf32> to vector<8x32xf32>
    %33 = vector.extract_strided_slice %19 {offsets = [0, 96], sizes = [8, 32], strides = [1, 1]} : vector<8x128xf32> to vector<8x32xf32>
    %34 = arith.mulf %25, %33 : vector<8x32xf32>
    %35 = arith.addf %32, %34 : vector<8x32xf32>
    %36 = math.tanh %35 : vector<8x32xf32>
    %cst_14 = arith.constant 1.000000e+00 : f32
    %37 = vector.broadcast %cst_14 : f32 to vector<8x32xf32>
    %38 = arith.subf %37, %31 : vector<8x32xf32>
    %39 = arith.mulf %38, %36 : vector<8x32xf32>
    %40 = arith.mulf %31, %13 : vector<8x32xf32>
    %41 = arith.addf %39, %40 : vector<8x32xf32>
    %c104 = arith.constant 104 : index
    %c0_15 = arith.constant 0 : index
    %42 = vector.load %arg4[%c104, %c0_15] : memref<320x160xf32, #tpu.memory_space<vmem>>, vector<32x128xf32>
    %c136 = arith.constant 136 : index
    %c0_16 = arith.constant 0 : index
    %43 = vector.load %arg4[%c136, %c0_16] : memref<320x160xf32, #tpu.memory_space<vmem>>, vector<128x8xf32>
    %c264 = arith.constant 264 : index
    %c0_17 = arith.constant 0 : index
    %44 = vector.load %arg4[%c264, %c0_17] : memref<320x160xf32, #tpu.memory_space<vmem>>, vector<48x8xf32>
    %c312 = arith.constant 312 : index
    %c0_18 = arith.constant 0 : index
    %45 = vector.load %arg4[%c312, %c0_18] : memref<320x160xf32, #tpu.memory_space<vmem>>, vector<1x8xf32>
    %cst_19 = arith.constant dense<0.000000e+00> : vector<8x128xf32>
    %46 = tpu.matmul %41, %42, %cst_19 {dimension_numbers = #tpu.dot_dimension_numbers<[1], [0], [0], [1], [0, 0, 1, 1], [], []>} : vector<8x32xf32>, vector<32x128xf32>, vector<8x128xf32> -> vector<8x128xf32>
    %47 = arith.mulf %10, %46 : vector<8x128xf32>
    %cst_20 = arith.constant dense<0.000000e+00> : vector<8x8xf32>
    %48 = tpu.matmul %47, %43, %cst_20 {dimension_numbers = #tpu.dot_dimension_numbers<[1], [0], [0], [1], [0, 0, 1, 1], [], []>} : vector<8x128xf32>, vector<128x8xf32>, vector<8x8xf32> -> vector<8x8xf32>
    %49 = tpu.concatenate %41, %12 in 1 : vector<8x32xf32>, vector<8x16xf32> -> vector<8x48xf32>
    %cst_21 = arith.constant dense<0.000000e+00> : vector<8x8xf32>
    %50 = tpu.matmul %49, %44, %cst_21 {dimension_numbers = #tpu.dot_dimension_numbers<[1], [0], [0], [1], [0, 0, 1, 1], [], []>} : vector<8x48xf32>, vector<48x8xf32>, vector<8x8xf32> -> vector<8x8xf32>
    %51 = arith.addf %48, %50 : vector<8x8xf32>
    %52 = vector.broadcast %45 : vector<1x8xf32> to vector<8x8xf32>
    %53 = arith.addf %51, %52 : vector<8x8xf32>
    %54 = tpu.concatenate %41, %53 in 1 : vector<8x32xf32>, vector<8x8xf32> -> vector<8x40xf32>
    %c0_22 = arith.constant 0 : index
    %c0_23 = arith.constant 0 : index
    %55 = vector.load %arg5[%c0_22, %c0_23] : memref<8x128xf32, #tpu.memory_space<vmem>>, vector<8x40xf32>
    tpu.vector_store %arg5[%c0_22, %c0_23], %54 {strides = array<i32>} : memref<8x128xf32, #tpu.memory_space<vmem>>, vector<8x40xf32>,
    return
  }
  func.func @transform_0(%arg0: i32) -> (i32, i32) {
    %c0_i32 = arith.constant 0 : i32
    %c0_i32_0 = arith.constant 0 : i32
    return %arg0, %c0_i32 : i32, i32
  }
  func.func @transform_1(%arg0: i32) -> (i32, i32) {
    %c0_i32 = arith.constant 0 : i32
    %c0_i32_0 = arith.constant 0 : i32
    return %arg0, %c0_i32 : i32, i32
  }
  func.func @transform_2(%arg0: i32) -> (i32, i32) {
    %c0_i32 = arith.constant 0 : i32
    %c0_i32_0 = arith.constant 0 : i32
    return %arg0, %c0_i32 : i32, i32
  }
  func.func @transform_3(%arg0: i32) -> (i32, i32) {
    %c0_i32 = arith.constant 0 : i32
    %c0_i32_0 = arith.constant 0 : i32
    %c0_i32_1 = arith.constant 0 : i32
    return %c0_i32, %c0_i32_0 : i32, i32
  }
  func.func @transform_4(%arg0: i32) -> (i32, i32) {
    %c0_i32 = arith.constant 0 : i32
    %c0_i32_0 = arith.constant 0 : i32
    return %arg0, %c0_i32 : i32, i32
  }
}

</mosaic_0001>

<bundles_post_ra>
// kernel: tpu_custom_call.1
= control target key start
LH: loop header
LB: loop body
LE: loop exit
PB: predicated region body
PF: predicated region fallthrough
CT: control target
= control target key end

     0   :  { %s729_s21 = smov 8   ;;  %v730_v6 = vmov 0.0   ;;  %v731_v10 = vmov 0.0|0.0   ;;  %s732_s12 = smov 32   ;;  %s953_s0 = inlined_call_operand.vmem [shape: f32[8,8], index: 0, kind: input, shape index: {}]   ;;  %s954_s1 = inlined_call_operand.vmem [shape: f32[8,16], index: 1, kind: input, shape index: {}]   ;;  %s955_s2 = inlined_call_operand.vmem [shape: f32[8,32], index: 2, kind: input, shape index: {}]   ;;  %s956_s3 = inlined_call_operand.vmem [shape: f32[320,160], index: 3, kind: input, shape index: {}]   ;;  %s957_s4 = inlined_call_operand.hbm [shape: f32[8,128], index: 4, kind: output, shape index: {}]  }
   0x1   :  { %v19_v0 = vld [vmem:[%s954_s1] sm:$0xff]  ;;  %v27_v1 = vld [vmem:[%s956_s3 + $0x8] sm:$0xff]  ;;  %v29_v2 = vld [vmem:[%s956_s3 + $0x18] sm:$0xff]  ;;  %113 = vmatprep.mubr.f32.mxu1 %v730_v6  ;;  %640 = vmatprep.subr.bf16.mxu0 %v731_v10 }
   0x2   :  { %21 = vrot.lane.b32.xlu0 %v19_v0, %s729_s21  ;;  %v636_v3 = vpack.c.bf16 %v29_v2, %v27_v1  ;;  %v26_v4 = vld [vmem:[%s956_s3] sm:$0xff]  ;;  %v28_v5 = vld [vmem:[%s956_s3 + $0x10] sm:$0xff]  ;;  %v31_v8 = vld [vmem:[%s956_s3 + $0x28] sm:$0xff] }
   0x3   :  { %v638_v7 = vpack.c.bf16 %v28_v5, %v26_v4  ;;  %v122_v9 = vld [vmem:[%s955_s2] sm:$0xff]  ;;  %v130_v12 = vld [vmem:[%s956_s3 + $0x50] sm:$0xff] }
   0x4   :  { %637 = vmatprep.subr.bf16.mxu1 %v636_v3  ;;  %v129_v11 = vld [vmem:[%s956_s3 + $0x40] sm:$0xff]  ;;  %v132_v15 = vld [vmem:[%s956_s3 + $0x70] sm:$0xff] }
   0x5   :  { %v131_v13 = vld [vmem:[%s956_s3 + $0x60] sm:$0xff]  ;;  %639 = vmatpush1.bf16.msra.mxu1 %v638_v7  ;;  %v641_v14 = vpack.c.bf16 %v130_v12, %v129_v11 }
   0x6   :  { %53 = vmatprep.subr.mxu1 %v31_v8  ;;  %v30_v16 = vld [vmem:[%s956_s3 + $0x20] sm:$0xff]  ;;  %124 = vrot.lane.b32.xlu0 %v122_v9, %s732_s12 }
   0x7   :  { %9 = vsyncpa [#allocation3], 0  ;;  %642 = vmatpush3.bf16.msra.mxu0 %v641_v14  ;;  %v644_v17 = vpack.c.bf16 %v132_v15, %v131_v13  ;;  %vm24_vm0 = vcmask 64512   ;;  %v18_v18 = vld [vmem:[%s953_s0] sm:$0xff]  ;;  %vm45_vm1 = vcmask 195584   ;;  %v134_v22 = vld [vmem:[%s956_s3 + $0x90] sm:$0xff]  ;;  %v35_v27 = vlaneseq }
   0x8   :  { %643 = vmatprep.subr.bf16.mxu0 %v731_v10  ;;  %v133_v21 = vld [vmem:[%s956_s3 + $0x80] sm:$0xff]  ;;  %v136_v25 = vld [vmem:[%s956_s3 + $0xb0] sm:$0xff]  ;;  %vm733_vm2 = vmmov 0   ;;  %vm127_vm3 = vcmask 261120   ;;  %vm138_vm4 = vcmask 523264   ;;  %s734_s1 = smov 64  }
   0x9   :  { %54 = vmatpush1.msra.mxu1 %v30_v16  ;;  %v647_v23 = vpack.c.bf16 %v134_v22, %v133_v21  ;;  %v135_v24 = vld [vmem:[%s956_s3 + $0xa0] sm:$0xff]  ;;  %572 = vmatprep.mubr.msk.f32.mxu0 %vm733_vm2, %v730_v6  ;;  %v36_v28 = vshrl.u32 %v35_v27, 7  ;;  %v512_v30 = vld [vmem:[%s956_s3 + $0x30] ss:$8 sm:$0x3]  ;;  %s735_s8 = smov 96  }
   0xa   :  { %667 = vmatprep.subr.bf16.mxu1 %v731_v10  ;;  %v650_v26 = vpack.c.bf16 %v136_v25, %v135_v24  ;;  %v137_v38 = vld [vmem:[%s956_s3 + $0xc0] ss:$0 sm:$0xff]  ;;  %v237_v51 = vld [vmem:[%s956_s3 + $0xd0] sm:$0xff]  ;;  %vm346_vm5 = vcmask 392192   ;;  %vm496_vm6 = vcmask 326656  }
   0xb   :  { %645 = vmatpush3.bf16.msra.mxu0 %v644_v17  ;;  %v41_v29 = vsub.s32 1, %v36_v28  ;;  %v37_v50 = vsub.s32 0, %v36_v28  ;;  %v238_v52 = vld [vmem:[%s956_s3 + $0xe0] sm:$0xff]  ;;  %v239_v53 = vld [vmem:[%s956_s3 + $0xf0] sm:$0xff] }
   0xc   :  { %646 = vmatprep.subr.bf16.mxu0 %v731_v10  ;;  %v653_v54 = vpack.c.bf16 %v238_v52, %v237_v51  ;;  %v240_v55 = vld [vmem:[%s956_s3 + $0x100] sm:$0xff]  ;;  %v241_v2 = vld [vmem:[%s956_s3 + $0x110] sm:$0xff] }
   0xd   :  { %v42_v31 = vrot.slane %v512_v30, %v41_v29  ;;  %v38_v56 = vrot.slane %v512_v30, %v37_v50  ;;  %v656_v57 = vpack.c.bf16 %v240_v55, %v239_v53  ;;  %v242_v3 = vld [vmem:[%s956_s3 + $0x120] sm:$0xff]  ;;  %v243_v4 = vld [vmem:[%s956_s3 + $0x130] sm:$0xff] }
   0xe   :  { %v668_v5 = vpack.c.bf16 %v242_v3, %v241_v2  ;;  %v244_v7 = vld [vmem:[%s956_s3 + $0x140] sm:$0xff]  ;;  %v245_v9 = vld [vmem:[%s956_s3 + $0x150] sm:$0xff] }
   0xf   :  { %648 = vmatpush3.bf16.msra.mxu0 %v647_v23  ;;  %v671_v8 = vpack.c.bf16 %v244_v7, %v243_v4  ;;  %v246_v11 = vld [vmem:[%s956_s3 + $0x160] sm:$0xff]  ;;  %v247_v13 = vld [vmem:[%s956_s3 + $0x170] sm:$0xff] }
  0x10   :  { %649 = vmatprep.subr.bf16.mxu0 %v731_v10  ;;  %v674_v12 = vpack.c.bf16 %v246_v11, %v245_v9  ;;  %v248_v14 = vld [vmem:[%s956_s3 + $0x180] sm:$0xff]  ;;  %v249_v16 = vld [vmem:[%s956_s3 + $0x190] sm:$0xff] }
  0x11   :  { %v677_v15 = vpack.c.bf16 %v248_v14, %v247_v13  ;;  %v250_v17 = vld [vmem:[%s956_s3 + $0x1a0] sm:$0xff]  ;;  %v253_v22 = vld [vmem:[%s956_s3 + $0x1d0] sm:$0xff] }
  0x12   :  { %v254_v23 = vld [vmem:[%s956_s3 + $0x1e0] sm:$0xff]  ;;  %v257_v25 = vld [vmem:[%s956_s3 + $0x210] sm:$0xff] }
  0x13   :  { %651 = vmatpush3.bf16.msra.mxu0 %v650_v26  ;;  %v686_v24 = vpack.c.bf16 %v254_v23, %v253_v22  ;;  %v258_v26 = vld [vmem:[%s956_s3 + $0x220] sm:$0xff]  ;;  %v259_v28 = vld [vmem:[%s956_s3 + $0x230] sm:$0xff] }
  0x14   :  { %652 = vmatprep.subr.bf16.mxu0 %v731_v10  ;;  %v659_v27 = vpack.c.bf16 %v258_v26, %v257_v25  ;;  %v260_v29 = vld [vmem:[%s956_s3 + $0x240] sm:$0xff] }
  0x74   :  { %v22_v19 = vpop.permute.xlu0 %21 }
  0x75   :  { %v25_v20 = vsel %vm24_vm0, %v18_v18, %v22_v19  ;;  %v680_v18 = vpack.c.bf16 %v250_v17, %v249_v16  ;;  %v251_v19 = vld [vmem:[%s956_s3 + $0x1b0] sm:$0xff] }
  0x76   :  { %513 = vmatmul.mubr.msk.f32.vlgmr.msra.gmra.mrb[0].mxu1 %vm45_vm1, %v25_v20  ;;  %v252_v20 = vld [vmem:[%s956_s3 + $0x1c0] sm:$0xff] }
  0x77   :  { %633 = vmatprep.mubr.msk.f32.mxu1 %vm733_vm2, %v730_v6  ;;  %669 = vmatpush3.bf16.msra.mxu1 %v668_v5  ;;  %v683_v21 = vpack.c.bf16 %v252_v20, %v251_v19 }
  0x78   :  { %v125_v35 = vpop.permute.xlu0 %124  ;;  %670 = vmatprep.subr.bf16.mxu1 %v731_v10 }
  0x7b   :  { %672 = vmatpush3.bf16.msra.mxu1 %v671_v8 }
  0x7c   :  { %673 = vmatprep.subr.bf16.mxu1 %v731_v10 }
  0x7f   :  { %675 = vmatpush3.bf16.msra.mxu1 %v674_v12 }
  0x80   :  { %676 = vmatprep.subr.bf16.mxu1 %v731_v10 }
  0x83   :  { %678 = vmatpush3.bf16.msra.mxu1 %v677_v15 }
  0x84   :  { %679 = vmatprep.subr.bf16.mxu1 %v731_v10 }
  0x87   :  { %681 = vmatpush3.bf16.msra.mxu1 %v680_v18 }
  0x88   :  { %682 = vmatprep.subr.bf16.mxu1 %v731_v10 }
  0x8b   :  { %684 = vmatpush3.bf16.msra.mxu1 %v683_v21 }
  0x8c   :  { %685 = vmatprep.subr.bf16.mxu1 %v731_v10 }
  0x8f   :  { %687 = vmatpush3.bf16.msra.mxu1 %v686_v24 }
  0x90   :  { %688 = vmatprep.subr.bf16.mxu1 %v731_v10 }
 0x149   :  { %v115_v32 = vpop.f32.mrb[0].mxu1 }
 0x14a   :  { %v117_v33 = vpop.f32.mrb[1].mxu1  ;;  %v848_v58 = vadd.f32 %v115_v32, %v38_v56  ;;  %v261_v32 = vld [vmem:[%s956_s3 + $0x250] sm:$0xff] }
 0x14b   :  { %v118_v34 = vadd.f32 %v117_v33, %v42_v31  ;;  %v662_v31 = vpack.c.bf16 %v260_v29, %v259_v28  ;;  %v262_v33 = vld [vmem:[%s956_s3 + $0x260] sm:$0xff] }
 0x14c   :  { %v120_v60 = vmax.f32 %v848_v58, 0.0 }
 0x14d   :  { %v121_v36 = vmax.f32 %v118_v34, 0.0  ;;  %v665_v34 = vpack.c.bf16 %v262_v33, %v261_v32 }
 0x14f   :  { %v128_v37 = vsel %vm127_vm3, %v121_v36, %v125_v35 }
 0x150   :  { %573 = vmatmul.mubr.msk.f32.vlgmr.msra.gmra.mrb[0].mxu0 %vm138_vm4, %v128_v37  ;;  %v256_v37 = vld [vmem:[%s956_s3 + $0x200] sm:$0xff] }
 0x151   :  { %583 = vmatprep.mubr.msk.f32.mxu0 %vm733_vm2, %v730_v6  ;;  %654 = vmatpush3.bf16.msra.mxu0 %v653_v54 }
 0x152   :  { %655 = vmatprep.subr.bf16.mxu0 %v731_v10 }
 0x155   :  { %657 = vmatpush3.bf16.msra.mxu0 %v656_v57 }
 0x156   :  { %658 = vmatprep.subr.bf16.mxu0 %v731_v10 }
 0x223   :  { %v208_v39 = vpop.f32.mrb[0].mxu0 }
 0x224   :  { %v209_v40 = vadd.f32 %v208_v39, %v137_v38  ;;  %v574_v41 = vpop.f32.mrb[1].mxu0 }
 0x226   :  { %219 = vrot.lane.b32.xlu1 %v209_v40, %s732_s12  ;;  %v515_v42 = vmul.f32 -1.442695, %v209_v40 }
 0x228   :  { %699 = vpow2.f32 %v515_v42 }
 0x232   :  { %v700_v43 = vpop.eup %699 }
 0x233   :  { %v215_v44 = vadd.f32 1.0, %v700_v43  ;;  %v263_v43 = vld [vmem:[%s956_s3 + $0x270] ss:$0 sm:$0xff] }
 0x235   :  { %701 = vrcp.f32 %v215_v44 }
 0x23f   :  { %v702_v45 = vpop.eup %701 }
 0x240   :  { %v229_v61 = vsub.f32 1.0, %v702_v45  ;;  %v235_v63 = vmul.f32 %v702_v45, %v125_v35 }
 0x298   :  { %v220_v46 = vpop.permute.xlu1 %219 }
 0x299   :  { %v222_v47 = vmul.f32 %v702_v45, %v220_v46 }
 0x29b   :  { %224 = vrot.lane.b32.xlu1 %v222_v47, %s734_s1  ;;  %s736_s1 = smov [#allocation2]  }
 0x29c   :  { %s504_s26 = sshll.u32 %s736_s1, 4  ;;  %s505_s26 = int_to_ptr.vmem [resolvable:$true] %s504_s26 }
 0x29d   :  { %s705_s27 = scalar_lea.vmem %s505_s26, 128  ;;  %p710_p1 = scmp.lt.s32.totalorder %s505_s26, %s505_s26 }
 0x29e   :  { %p706_p0 = scmp.ne.s32.totalorder %s505_s26, %s705_s27  ;;  %p711_p2 = scmp.lt.s32.totalorder %s705_s27, %s705_s27 }
 0x2a0   :  { %p712_p3 = por %p711_p2, %p710_p1 }
 0x2a2   :  { %p713_p4 = pnand %p712_p3, %p706_p0 }
 0x30d   :  { %v225_v48 = vpop.permute.xlu1 %224 }
 0x30e   :  { %v227_v49 = vadd.f32 %v225_v48, %v209_v40 }
 0x310   :  { %703 = vtanh.f32 %v227_v49 }
 0x31a   :  { %v704_v59 = vpop.eup %703 }
 0x31b   :  { %231 = vrot.lane.b32.xlu0 %v704_v59, %s735_s8 }
 0x31f   :  { %342 = vrot.lane.b32.xlu0 %v120_v60, %s732_s12 }
 0x38d   :  { %v232_v62 = vpop.permute.xlu0 %231 }
 0x38e   :  { %v234_v0 = vmul.f32 %v232_v62, %v229_v61 }
 0x390   :  { %v236_v1 = vadd.f32 %v235_v63, %v234_v0 }
 0x391   :  { %v343_v35 = vpop.permute.xlu0 %342 }
 0x392   :  { %265 = vrot.lane.b32.xlu1 %v236_v1, %s735_s8 }
 0x404   :  { %v266_v30 = vpop.permute.xlu1 %265 }
 0x405   :  { %584 = vmatmul.mubr.msk.f32.vlgmr.msra.gmra.mrb[2].mxu0 %vm127_vm3, %v266_v30  ;;  %v345_v36 = vsel %vm127_vm3, %v266_v30, %v343_v35 }
 0x406   :  { %660 = vmatpush3.bf16.msra.mxu0 %v659_v27  ;;  %598 = vmatprep.mubr.msk.f32.mxu0 %vm733_vm2, %v730_v6  ;;  %v255_v6 = vld [vmem:[%s956_s3 + $0x1f0] sm:$0xff] }
 0x407   :  { %661 = vmatprep.subr.bf16.mxu0 %v731_v10  ;;  %v689_v38 = vpack.c.bf16 %v256_v37, %v255_v6 }
 0x409   :  { %690 = vmatpush3.bf16.msra.mxu1 %v689_v38 }
 0x40a   :  { %663 = vmatpush3.bf16.msra.mxu0 %v662_v31 }
 0x40b   :  { %664 = vmatprep.subr.bf16.mxu0 %v731_v10 }
 0x40e   :  { %666 = vmatpush3.bf16.msra.mxu0 %v665_v34 }
 0x411   :  { %599 = vmatmul.mubr.msk.f32.vlgmr.msra.gmra.mrb[4].mxu0 %vm346_vm5, %v345_v36 }
 0x4d8   :  { %v335_v39 = vpop.f32.mrb[2].mxu0 }
 0x4d9   :  { %v339_v10 = vmul.f32 %v335_v39, %v120_v60  ;;  %v585_v40 = vpop.f32.mrb[3].mxu0 }
 0x4db   :  { %634 = vmatmul.mubr.f32.vlgmr.msra.gmra.mrb[2].mxu1 %v339_v10 }
 0x4e4   :  { %v416_v41 = vpop.f32.mrb[4].mxu0 }
 0x4e5   :  { %v600_v42 = vpop.f32.mrb[5].mxu0 }
 0x5ae   :  { %v486_v44 = vpop.f32.mrb[2].mxu1 }
 0x5af   :  { %v487_v45 = vadd.f32 %v486_v44, %v416_v41  ;;  %v635_v46 = vpop.f32.mrb[3].mxu1 }
 0x5b1   :  { %v490_v47 = vadd.f32 %v487_v45, %v263_v43 }
 0x5b3   :  { %492 = vrot.lane.b32.xlu1 %v490_v47, %s732_s12 }
 0x625   :  { %v493_v48 = vpop.permute.xlu1 %492 }
 0x626   :  { %v495_v49 = vsel %vm127_vm3, %v266_v30, %v493_v48 }
 0x627   :  { %497 = vst.msk [vmem:[#allocation2] sm:$0xff] %vm496_vm6, %v495_v49 }
 0x628   :  { %716 = shalt.err (!%p713_p4)
}
 0x629   :  { %s717_s29 = scalar_lea.hbm %s957_s4, 128 }
 0x62a   :  { %p718_p5 = scmp.ne.s32.totalorder %s957_s4, %s717_s29  ;;  %p721_p6 = scmp.lt.u32.totalorder %s717_s29, %s957_s4 }
 0x62c   :  { %p723_p7 = pnand %p721_p6, %p718_p5 }
 0x62e   :  { %726 = shalt.err (!%p723_p7)
}
 0x62f   :  { %507 = dma.vmem_to_hbm [thread:$0]  %s505_s26, 128, %s957_s4, [#allocation3]  }
 0x630   :  { %727 = dma.done.wait [#allocation3], 128  }
 0x631   :  { %728 = vsyncadd [#allocation3], 4294967168 }
 0x632   :  { %511 = vsyncpa [#allocation3], 1 }

</bundles_post_ra>
